<compile_context>
chip_gen: v7x
topology: tpu7x:2x2x1
jax: 0.10.0
libtpu: 0.0.40
codegen_flags: <defaults>
</compile_context>

<pallas_src>
import functools

import jax
import jax.numpy as jnp
from jax import lax
from jax.experimental import pallas as pl
from jax.experimental.pallas import tpu as pltpu

SMOOTH = 1e-6
_TN = 128                      # lane width
_ROW_TILE = 8                  # f32 sublane tile height
_MIN_BLOCK_ROWS = 32           # covers (8,128) f32 / (16,128) bf16 / (32,128) i8 tiles


def _device_kind():
    try:
        return jax.devices()[0].device_kind.lower()
    except Exception:  # pragma: no cover - no accelerator visible
        return ""


_KIND = _device_kind()
_IS_V7X = "v7" in _KIND
_NUM_CORES = 2 if _IS_V7X else 1            # v7x: 2 TensorCores per chip
_MAX_BLOCK_ROWS = 4096 if _IS_V7X else 2048 # (rows,128) f32 block = 2 MiB / 1 MiB
_VMEM_LIMIT = (48 if _IS_V7X else 32) * 1024 * 1024


def _choose_block_rows(rows):
    """Largest power-of-two block (<= max) that doesn't over-tile small inputs.

    `rows` is already a multiple of 8, so every returned value keeps the
    (8, 128) reshape in `fold()` exact.
    """
    if rows <= _MIN_BLOCK_ROWS:
        return rows                          # full-extent block
    per_core = pl.cdiv(rows, _NUM_CORES)
    br = _MAX_BLOCK_ROWS
    while br > _MIN_BLOCK_ROWS and br > per_core:
        br //= 2
    return br


def _loss_sums_kernel(pred_ref, targ_ref, dist_ref, out_ref, *,
                      steps_per_core, rows_valid, block_rows, ragged):
    """Accumulates 4 partial-sum slabs into out_ref of shape (1, 4, 8, 128).

    slab 0: pred * target                    (dice intersection)
    slab 1: pred
    slab 2: target
    slab 3: distance_map * BCE(pred, target) (elementwise, un-averaged)
    """
    c = pl.program_id(0)
    i = pl.program_id(1)

    @pl.when(i == 0)
    def _init():
        out_ref[...] = jnp.zeros_like(out_ref)

    p = pred_ref[...].astype(jnp.float32)
    t = targ_ref[...].astype(jnp.float32)
    d = dist_ref[...].astype(jnp.float32)

    def fold(x):
        # (block_rows, 128) -> (8, 128): pure VPU vreg adds, no XLU work.
        return jnp.sum(x.reshape(-1, _ROW_TILE, _TN), axis=0)

    def accumulate(p, t, d):
        # torch.nn.functional.binary_cross_entropy on probabilities; PyTorch
        # clamps the log terms at -100 (this also makes all-zero rows/lanes
        # contribute exactly 0).  Algebraically folded form of
        # -(t*log(p) + (1-t)*log(1-p)).
        log_p = jnp.maximum(jnp.log(p), -100.0)
        log_1mp = jnp.maximum(jnp.log1p(-p), -100.0)
        bce = -(log_1mp + t * (log_p - log_1mp))
        out_ref[0, 0] += fold(p * t)
        out_ref[0, 1] += fold(p)
        out_ref[0, 2] += fold(t)
        out_ref[0, 3] += fold(d * bce)

    if not ragged:
        # Grid divides the row extent exactly: no masking anywhere.
        accumulate(p, t, d)
    else:
        row0 = (c * steps_per_core + i) * block_rows     # global row of this tile
        tile_full = row0 + block_rows <= rows_valid

        @pl.when(tile_full)
        def _plain():
            accumulate(p, t, d)

        @pl.when(jnp.logical_not(tile_full))
        def _masked():
            # Partial (or fully out-of-range) tile: rows past `rows_valid` hold
            # undefined data -- zero them before any math touches them.
            rows_left = rows_valid - row0                # may be <= 0
            rid = lax.broadcasted_iota(jnp.int32, (block_rows, _TN), 0)
            m = rid < rows_left
            accumulate(jnp.where(m, p, 0.0),
                       jnp.where(m, t, 0.0),
                       jnp.where(m, d, 0.0))


def _reduce_sums(pred, target, distance_map):
    """Returns (sum(p*t), sum(p), sum(t), sum(d*bce)) as a (4,) f32 array."""
    total = pred.size
    # Round rows up to a multiple of 8 so every block/fold is (8,128)-exact.
    rows = pl.cdiv(total, _ROW_TILE * _TN) * _ROW_TILE
    padded_total = rows * _TN

    def prep(x):
        flat = x.reshape(-1)                 # free bitcast, keeps input dtype
        if padded_total != total:
            # Rare path (numel % 1024 != 0): pad < 1024 zeros; zeros contribute
            # exactly 0 to every partial sum (see the -100 clamp above).
            flat = jnp.pad(flat, (0, padded_total - total))
        return flat.reshape(rows, _TN)

    p2, t2, d2 = prep(pred), prep(target), prep(distance_map)

    block_rows = _choose_block_rows(rows)
    steps_total = pl.cdiv(rows, block_rows)
    steps_per_core = pl.cdiv(steps_total, _NUM_CORES)
    ragged = rows != _NUM_CORES * steps_per_core * block_rows

    def in_map(c, i):
        # Clamp so the DMA never targets a block entirely past the array; the
        # in-kernel row mask zeroes any contribution from clamped/partial tiles.
        return (jnp.minimum(c * steps_per_core + i, steps_total - 1), 0)

    in_spec = pl.BlockSpec((block_rows, _TN), in_map)
    out_spec = pl.BlockSpec((1, 4, _ROW_TILE, _TN), lambda c, i: (c, 0, 0, 0))

    kernel = functools.partial(
        _loss_sums_kernel,
        steps_per_core=steps_per_core,
        rows_valid=rows,
        block_rows=block_rows,
        ragged=ragged,
    )

    partials = pl.pallas_call(
        kernel,
        out_shape=jax.ShapeDtypeStruct((_NUM_CORES, 4, _ROW_TILE, _TN),
                                       jnp.float32),
        grid_spec=pltpu.PrefetchScalarGridSpec(
            num_scalar_prefetch=0,
            grid=(_NUM_CORES, steps_per_core),
            in_specs=[in_spec, in_spec, in_spec],
            out_specs=out_spec,
        ),
        compiler_params=pltpu.CompilerParams(
            dimension_semantics=("parallel", "arbitrary"),
            vmem_limit_bytes=_VMEM_LIMIT,
        ),
    )(p2, t2, d2)

    # Tiny finalize: collapse the per-core (8,128) slabs to the 4 scalars.
    return jnp.sum(partials, axis=(0, 2, 3))


@jax.jit
def distance_transform_uncertainty_loss(pred, target, distance_map,
                                        smooth=SMOOTH):
    """JAX/Pallas equivalent of DistanceTransformUncertaintyLoss.forward.

    Inputs may be f32 or bf16 (they are streamed in their stored dtype and
    upcast to f32 inside the kernel; accumulation is always f32).
    """
    sums = _reduce_sums(pred, target, distance_map)
    inter, sum_p, sum_t, sum_wce = sums[0], sums[1], sums[2], sums[3]

    dice_loss = 1.0 - (2.0 * inter + smooth) / (sum_p + sum_t + smooth)
    weighted_ce_mean = sum_wce / jnp.float32(pred.size)
    return weighted_ce_mean + dice_loss


def _reference_loss(pred, target, distance_map, smooth=SMOOTH):
    """Pure-JAX reference mirroring the PyTorch module (for verification)."""
    pred = pred.astype(jnp.float32)
    target = target.astype(jnp.float32)
    distance_map = distance_map.astype(jnp.float32)
    log_p = jnp.maximum(jnp.log(pred), -100.0)
    log_1mp = jnp.maximum(jnp.log1p(-pred), -100.0)
    ce = -(target * log_p + (1.0 - target) * log_1mp)
    inter = jnp.sum(pred * target)
    dice = 1.0 - (2.0 * inter + smooth) / (
        jnp.sum(pred) + jnp.sum(target) + smooth)
    return jnp.mean(distance_map * ce) + dice


if __name__ == "__main__":
    key = jax.random.PRNGKey(0)

    # Three small (B, 1, H, W) cases:
    #   (2,1,16,16): numel=512   -> tiny-pad path (numel % 1024 != 0)
    #   (2,1,48,64): numel=6144  -> no pad, ragged last tile -> in-kernel mask
    #   (2,1,64,64): numel=8192  -> no pad, exactly divisible -> plain path
    shapes = [(2, 1, 16, 16), (2, 1, 48, 64), (2, 1, 64, 64)]

    for shape in shapes:
        key, k1, k2, k3 = jax.random.split(key, 4)
        pred = jax.random.uniform(k1, shape, dtype=jnp.float32,
                                  minval=0.01, maxval=0.99)   # probabilities
        target = (jax.random.uniform(k2, shape) > 0.5).astype(jnp.float32)
        distance_map = jax.random.uniform(k3, shape, dtype=jnp.float32)

        loss = distance_transform_uncertainty_loss(pred, target, distance_map)
        loss = jax.block_until_ready(loss)

        ref = _reference_loss(pred, target, distance_map)
        assert jnp.allclose(loss, ref, rtol=1e-5, atol=1e-5), (shape, loss, ref)

    print("KERNEL_OK")
</pallas_src>

<mosaic_0001>
module attributes {stable_mosaic.version = 11 : i64} {
  func.func @_loss_sums_kernel(%arg0: i32, %arg1: i32, %arg2: memref<8x128xf32, #tpu.memory_space<vmem>>, %arg3: memref<8x128xf32, #tpu.memory_space<vmem>>, %arg4: memref<8x128xf32, #tpu.memory_space<vmem>>, %arg5: memref<1x4x8x128xf32, #tpu.memory_space<vmem>>) attributes {dimension_semantics = [#tpu.dimension_semantics<parallel>, #tpu.dimension_semantics<arbitrary>], iteration_bounds = array<i64: 1, 1>, scalar_prefetch = 0 : i64, scratch_operands = 0 : i64, tpu.core_type = #tpu.core_type<tc>, window_params = [{transform_indices = @transform_0, window_bounds = array<i64: 8, 128>}, {transform_indices = @transform_1, window_bounds = array<i64: 8, 128>}, {transform_indices = @transform_2, window_bounds = array<i64: 8, 128>}, {transform_indices = @transform_3, window_bounds = array<i64: 1, 4, 8, 128>}]} {
    %c0_i32 = arith.constant 0 : i32
    %0 = arith.cmpi eq, %arg1, %c0_i32 : i32
    %1 = arith.extui %0 : i1 to i32
    %c0_i32_0 = arith.constant 0 : i32
    %2 = arith.cmpi ne, %1, %c0_i32_0 : i32
    scf.if %2 {
      %cst_42 = arith.constant 0.000000e+00 : f32
      %53 = vector.broadcast %cst_42 : f32 to vector<1x4x8x128xf32>
      %c0_43 = arith.constant 0 : index
      %c0_44 = arith.constant 0 : index
      %c0_45 = arith.constant 0 : index
      %c0_46 = arith.constant 0 : index
      %54 = vector.load %arg5[%c0_43, %c0_44, %c0_45, %c0_46] : memref<1x4x8x128xf32, #tpu.memory_space<vmem>>, vector<1x4x8x128xf32>
      tpu.vector_store %arg5[%c0_43, %c0_44, %c0_45, %c0_46], %53 {strides = array<i32>} : memref<1x4x8x128xf32, #tpu.memory_space<vmem>>, vector<1x4x8x128xf32>,
    } else {
    }
    %c0 = arith.constant 0 : index
    %c0_1 = arith.constant 0 : index
    %3 = vector.load %arg2[%c0, %c0_1] : memref<8x128xf32, #tpu.memory_space<vmem>>, vector<8x128xf32>
    %c0_2 = arith.constant 0 : index
    %c0_3 = arith.constant 0 : index
    %4 = vector.load %arg3[%c0_2, %c0_3] : memref<8x128xf32, #tpu.memory_space<vmem>>, vector<8x128xf32>
    %c0_4 = arith.constant 0 : index
    %c0_5 = arith.constant 0 : index
    %5 = vector.load %arg4[%c0_4, %c0_5] : memref<8x128xf32, #tpu.memory_space<vmem>>, vector<8x128xf32>
    %6 = math.log %3 : vector<8x128xf32>
    %cst = arith.constant -1.000000e+02 : f32
    %7 = vector.broadcast %cst : f32 to vector<8x128xf32>
    %8 = arith.maximumf %6, %7 : vector<8x128xf32>
    %cst_6 = arith.constant 0.000000e+00 : f32
    %9 = vector.broadcast %cst_6 : f32 to vector<8x128xf32>
    %10 = arith.subf %9, %3 : vector<8x128xf32>
    %11 = math.log1p %10 : vector<8x128xf32>
    %cst_7 = arith.constant -1.000000e+02 : f32
    %12 = vector.broadcast %cst_7 : f32 to vector<8x128xf32>
    %13 = arith.maximumf %11, %12 : vector<8x128xf32>
    %14 = arith.subf %8, %13 : vector<8x128xf32>
    %15 = arith.mulf %4, %14 : vector<8x128xf32>
    %16 = arith.addf %13, %15 : vector<8x128xf32>
    %cst_8 = arith.constant 0.000000e+00 : f32
    %17 = vector.broadcast %cst_8 : f32 to vector<8x128xf32>
    %18 = arith.subf %17, %16 : vector<8x128xf32>
    %c0_9 = arith.constant 0 : index
    %c0_10 = arith.constant 0 : index
    %c0_11 = arith.constant 0 : index
    %c0_12 = arith.constant 0 : index
    %19 = vector.load %arg5[%c0_9, %c0_10, %c0_11, %c0_12] : memref<1x4x8x128xf32, #tpu.memory_space<vmem>>, vector<1x1x8x128xf32>
    %20 = vector.shape_cast %19 : vector<1x1x8x128xf32> to vector<8x128xf32>
    %21 = arith.mulf %3, %4 : vector<8x128xf32>
    %22 = vector.shape_cast %21 : vector<8x128xf32> to vector<1x8x128xf32>
    %cst_13 = arith.constant dense<0.000000e+00> : vector<8x128xf32>
    %23 = vector.multi_reduction <add>, %22, %cst_13 [0] : vector<1x8x128xf32> to vector<8x128xf32>
    %24 = arith.addf %20, %23 : vector<8x128xf32>
    %c0_14 = arith.constant 0 : index
    %c0_15 = arith.constant 0 : index
    %c0_16 = arith.constant 0 : index
    %c0_17 = arith.constant 0 : index
    %25 = vector.load %arg5[%c0_14, %c0_15, %c0_16, %c0_17] : memref<1x4x8x128xf32, #tpu.memory_space<vmem>>, vector<1x1x8x128xf32>
    %26 = vector.shape_cast %25 : vector<1x1x8x128xf32> to vector<8x128xf32>
    %27 = vector.shape_cast %24 : vector<8x128xf32> to vector<1x1x8x128xf32>
    tpu.vector_store %arg5[%c0_14, %c0_15, %c0_16, %c0_17], %27 {strides = array<i32>} : memref<1x4x8x128xf32, #tpu.memory_space<vmem>>, vector<1x1x8x128xf32>,
    %c0_18 = arith.constant 0 : index
    %c1 = arith.constant 1 : index
    %c0_19 = arith.constant 0 : index
    %c0_20 = arith.constant 0 : index
    %28 = vector.load %arg5[%c0_18, %c1, %c0_19, %c0_20] : memref<1x4x8x128xf32, #tpu.memory_space<vmem>>, vector<1x1x8x128xf32>
    %29 = vector.shape_cast %28 : vector<1x1x8x128xf32> to vector<8x128xf32>
    %30 = vector.shape_cast %3 : vector<8x128xf32> to vector<1x8x128xf32>
    %cst_21 = arith.constant dense<0.000000e+00> : vector<8x128xf32>
    %31 = vector.multi_reduction <add>, %30, %cst_21 [0] : vector<1x8x128xf32> to vector<8x128xf32>
    %32 = arith.addf %29, %31 : vector<8x128xf32>
    %c0_22 = arith.constant 0 : index
    %c1_23 = arith.constant 1 : index
    %c0_24 = arith.constant 0 : index
    %c0_25 = arith.constant 0 : index
    %33 = vector.load %arg5[%c0_22, %c1_23, %c0_24, %c0_25] : memref<1x4x8x128xf32, #tpu.memory_space<vmem>>, vector<1x1x8x128xf32>
    %34 = vector.shape_cast %33 : vector<1x1x8x128xf32> to vector<8x128xf32>
    %35 = vector.shape_cast %32 : vector<8x128xf32> to vector<1x1x8x128xf32>
    tpu.vector_store %arg5[%c0_22, %c1_23, %c0_24, %c0_25], %35 {strides = array<i32>} : memref<1x4x8x128xf32, #tpu.memory_space<vmem>>, vector<1x1x8x128xf32>,
    %c0_26 = arith.constant 0 : index
    %c2 = arith.constant 2 : index
    %c0_27 = arith.constant 0 : index
    %c0_28 = arith.constant 0 : index
    %36 = vector.load %arg5[%c0_26, %c2, %c0_27, %c0_28] : memref<1x4x8x128xf32, #tpu.memory_space<vmem>>, vector<1x1x8x128xf32>
    %37 = vector.shape_cast %36 : vector<1x1x8x128xf32> to vector<8x128xf32>
    %38 = vector.shape_cast %4 : vector<8x128xf32> to vector<1x8x128xf32>
    %cst_29 = arith.constant dense<0.000000e+00> : vector<8x128xf32>
    %39 = vector.multi_reduction <add>, %38, %cst_29 [0] : vector<1x8x128xf32> to vector<8x128xf32>
    %40 = arith.addf %37, %39 : vector<8x128xf32>
    %c0_30 = arith.constant 0 : index
    %c2_31 = arith.constant 2 : index
    %c0_32 = arith.constant 0 : index
    %c0_33 = arith.constant 0 : index
    %41 = vector.load %arg5[%c0_30, %c2_31, %c0_32, %c0_33] : memref<1x4x8x128xf32, #tpu.memory_space<vmem>>, vector<1x1x8x128xf32>
    %42 = vector.shape_cast %41 : vector<1x1x8x128xf32> to vector<8x128xf32>
    %43 = vector.shape_cast %40 : vector<8x128xf32> to vector<1x1x8x128xf32>
    tpu.vector_store %arg5[%c0_30, %c2_31, %c0_32, %c0_33], %43 {strides = array<i32>} : memref<1x4x8x128xf32, #tpu.memory_space<vmem>>, vector<1x1x8x128xf32>,
    %c0_34 = arith.constant 0 : index
    %c3 = arith.constant 3 : index
    %c0_35 = arith.constant 0 : index
    %c0_36 = arith.constant 0 : index
    %44 = vector.load %arg5[%c0_34, %c3, %c0_35, %c0_36] : memref<1x4x8x128xf32, #tpu.memory_space<vmem>>, vector<1x1x8x128xf32>
    %45 = vector.shape_cast %44 : vector<1x1x8x128xf32> to vector<8x128xf32>
    %46 = arith.mulf %5, %18 : vector<8x128xf32>
    %47 = vector.shape_cast %46 : vector<8x128xf32> to vector<1x8x128xf32>
    %cst_37 = arith.constant dense<0.000000e+00> : vector<8x128xf32>
    %48 = vector.multi_reduction <add>, %47, %cst_37 [0] : vector<1x8x128xf32> to vector<8x128xf32>
    %49 = arith.addf %45, %48 : vector<8x128xf32>
    %c0_38 = arith.constant 0 : index
    %c3_39 = arith.constant 3 : index
    %c0_40 = arith.constant 0 : index
    %c0_41 = arith.constant 0 : index
    %50 = vector.load %arg5[%c0_38, %c3_39, %c0_40, %c0_41] : memref<1x4x8x128xf32, #tpu.memory_space<vmem>>, vector<1x1x8x128xf32>
    %51 = vector.shape_cast %50 : vector<1x1x8x128xf32> to vector<8x128xf32>
    %52 = vector.shape_cast %49 : vector<8x128xf32> to vector<1x1x8x128xf32>
    tpu.vector_store %arg5[%c0_38, %c3_39, %c0_40, %c0_41], %52 {strides = array<i32>} : memref<1x4x8x128xf32, #tpu.memory_space<vmem>>, vector<1x1x8x128xf32>,
    return
  }
  func.func @transform_0(%arg0: i32, %arg1: i32) -> (i32, i32) {
    %c1_i32 = arith.constant 1 : i32
    %0 = arith.muli %arg0, %c1_i32 : i32
    %1 = arith.addi %0, %arg1 : i32
    %c0_i32 = arith.constant 0 : i32
    %2 = arith.minsi %1, %c0_i32 : i32
    %c0_i32_0 = arith.constant 0 : i32
    %c0_i32_1 = arith.constant 0 : i32
    return %2, %c0_i32_0 : i32, i32
  }
  func.func @transform_1(%arg0: i32, %arg1: i32) -> (i32, i32) {
    %c1_i32 = arith.constant 1 : i32
    %0 = arith.muli %arg0, %c1_i32 : i32
    %1 = arith.addi %0, %arg1 : i32
    %c0_i32 = arith.constant 0 : i32
    %2 = arith.minsi %1, %c0_i32 : i32
    %c0_i32_0 = arith.constant 0 : i32
    %c0_i32_1 = arith.constant 0 : i32
    return %2, %c0_i32_0 : i32, i32
  }
  func.func @transform_2(%arg0: i32, %arg1: i32) -> (i32, i32) {
    %c1_i32 = arith.constant 1 : i32
    %0 = arith.muli %arg0, %c1_i32 : i32
    %1 = arith.addi %0, %arg1 : i32
    %c0_i32 = arith.constant 0 : i32
    %2 = arith.minsi %1, %c0_i32 : i32
    %c0_i32_0 = arith.constant 0 : i32
    %c0_i32_1 = arith.constant 0 : i32
    return %2, %c0_i32_0 : i32, i32
  }
  func.func @transform_3(%arg0: i32, %arg1: i32) -> (i32, i32, i32, i32) {
    %c0_i32 = arith.constant 0 : i32
    %c0_i32_0 = arith.constant 0 : i32
    %c0_i32_1 = arith.constant 0 : i32
    %c0_i32_2 = arith.constant 0 : i32
    return %arg0, %c0_i32, %c0_i32_0, %c0_i32_1 : i32, i32, i32, i32
  }
}

</mosaic_0001>

<bundles_post_ra>
// kernel: distance_transform_uncertainty_loss.1
= control target key start
LH: loop header
LB: loop body
LE: loop exit
PB: predicated region body
PF: predicated region fallthrough
CT: control target
= control target key end

     0   :  { %s219_s0 = inlined_call_operand.vmem [shape: f32[8,128], index: 0, kind: input, shape index: {}]   ;;  %s220_s1 = inlined_call_operand.vmem [shape: f32[8,128], index: 1, kind: input, shape index: {}]   ;;  %s221_s3 = inlined_call_operand.vmem [shape: f32[1,4,8,128], index: 3, kind: output, shape index: {}]   ;;  %s222_s2 = inlined_call_operand.vmem [shape: f32[8,128], index: 2, kind: input, shape index: {}]  }
   0x1   :  { %v103_v0 = vld [vmem:[%s219_s0] sm:$0xff] }
   0x2   :  { %v104_v1 = vld [vmem:[%s220_s1] sm:$0xff]  ;;  %174 = vlog2.f32 %v103_v0  ;;  %v109_v2 = vsub.f32 0.0, %v103_v0  ;;  %168 = vst [vmem:[%s221_s3 + $0x8] sm:$0xff] %v103_v0 }
   0x3   :  { %v125_v3 = vmul.f32 %v104_v1, %v103_v0  ;;  %170 = vst [vmem:[%s221_s3 + $0x10] sm:$0xff] %v104_v1  ;;  %v105_v19 = vld [vmem:[%s222_s2] sm:$0xff] }
   0x4   :  { %v110_v4 = vadd.f32 1.0, %v109_v2  ;;  %v113_v5 = vmul.f32 -0.5, %v109_v2  ;;  %v116_v8 = vand.u32 2147483647, %v109_v2 }
   0x5   :  { %128 = vst [vmem:[%s221_s3] sm:$0xff] %v125_v3 }
   0x6   :  { %176 = vlog2.f32 %v110_v4  ;;  %v114_v6 = vadd.f32 1.0, %v113_v5  ;;  %vm117_vm0 = vcmp.lt.f32.partialorder %v116_v8, 0.0004427343 }
   0x8   :  { %v115_v10 = vmul.f32 %v114_v6, %v109_v2 }
   0xc   :  { %v175_v7 = vpop.eup %174 }
   0xd   :  { %v107_v9 = vmul.f32 0.6931472, %v175_v7 }
   0xf   :  { %v108_v13 = vmax.f32 %v107_v9, -100.0 }
  0x10   :  { %v177_v11 = vpop.eup %176 }
  0x11   :  { %v112_v12 = vmul.f32 0.6931472, %v177_v11 }
  0x13   :  { %v118_v14 = vsel %vm117_vm0, %v115_v10, %v112_v12 }
  0x14   :  { %v119_v15 = vmax.f32 %v118_v14, -100.0 }
  0x16   :  { %v120_v16 = vsub.f32 %v108_v13, %v119_v15 }
  0x18   :  { %v121_v17 = vmul.f32 %v120_v16, %v104_v1 }
  0x1a   :  { %v122_v18 = vadd.f32 %v121_v17, %v119_v15 }
  0x1c   :  { %v123_v20 = vsub.f32 0.0, %v122_v18 }
  0x1e   :  { %v141_v21 = vmul.f32 %v123_v20, %v105_v19 }
  0x20   :  { %172 = vst [vmem:[%s221_s3 + $0x18] sm:$0xff] %v141_v21 }

</bundles_post_ra>
